<compile_context>
chip_gen: v7x
topology: tpu7x:2x2x1
jax: 0.10.0
libtpu: 0.0.40
codegen_flags: <defaults>
</compile_context>

<pallas_src>
import jax
import jax.numpy as jnp
from jax.experimental import pallas as pl
from jax.experimental.pallas import tpu as pltpu

D_F = 48
D_K = 16
D_V = 16
D_Q = 16

_TILE_S = 1024  # sequence (lane-axis) tile for large inputs


def _proj_kernel(w_ref, x_ref, o_ref):
    # w_ref: (d_out, d_f)  -- resident across the whole grid
    # x_ref: (d_f, TS)     -- native activation tile, sequence on lanes
    # o_ref: (d_out, TS)   -- lane-dense output tile
    o_ref[...] = jnp.dot(
        w_ref[...], x_ref[...], preferred_element_type=jnp.float32
    ).astype(o_ref.dtype)


def _fused_proj(w, x, *, tile_s=_TILE_S):
    """Compute w @ x with w: (d_out, d_f), x: (d_f, S) -> (d_out, S)."""
    d_out, d_f = w.shape
    d_f2, S = x.shape
    assert d_f == d_f2, (d_f, d_f2)

    # Single full block for small sequences (always a legal block shape);
    # otherwise a 128-aligned tile (Pallas masks the ragged tail block).
    ts = S if S <= tile_s else tile_s
    grid = (pl.cdiv(S, ts),)

    return pl.pallas_call(
        _proj_kernel,
        out_shape=jax.ShapeDtypeStruct((d_out, S), x.dtype),
        grid=grid,
        in_specs=[
            pl.BlockSpec((d_out, d_f), lambda i: (0, 0)),  # weights stay in VMEM
            pl.BlockSpec((d_f, ts), lambda i: (0, i)),     # activation tile
        ],
        out_specs=pl.BlockSpec((d_out, ts), lambda i: (0, i)),
        compiler_params=pltpu.CompilerParams(
            dimension_semantics=("parallel",),  # shard seq tiles across TCs (v7x)
        ),
    )(w, x)


def kv_splitter(x, q, wk, wq, wv):
    """x: (d_f, N), q: (d_f, M); wk/wq/wv: (d_out, d_f) torch Linear layout.

    Returns (K, Q, V) with K:(N,d_k), Q:(M,d_q), V:(N,d_v), matching
    KVSplitter.forward.
    """
    # Fuse K and V projections into one matmul (static 32x48 weight concat).
    w_kv = jnp.concatenate([wk, wv], axis=0)  # (d_k + d_v, d_f)

    kv_t = _fused_proj(w_kv, x)  # (d_k + d_v, N): rows [0:16]=K^T, [16:32]=V^T
    q_t = _fused_proj(wq, q)     # (d_q, M) = Q^T

    # Glue back to PyTorch's (seq, d_out) output layout.
    K = jnp.transpose(kv_t[:D_K, :])   # (N, d_k)
    V = jnp.transpose(kv_t[D_K:, :])   # (N, d_v)
    Q = jnp.transpose(q_t)             # (M, d_q)
    return K, Q, V


if __name__ == "__main__":
    key = jax.random.PRNGKey(0)
    k_x, k_q, k_wk, k_wq, k_wv = jax.random.split(key, 5)

    N = 8  # sequence length for x
    M = 8  # sequence length for q

    # Inputs in PyTorch layout: (d_f, seq)
    x = jax.random.normal(k_x, (D_F, N), dtype=jnp.float32)
    q = jax.random.normal(k_q, (D_F, M), dtype=jnp.float32)

    # torch.nn.Linear weight shape: (out_features, in_features)
    wk = jax.random.uniform(k_wk, (D_K, D_F), minval=-0.1, maxval=0.1,
                            dtype=jnp.float32)
    wq = jax.random.uniform(k_wq, (D_Q, D_F), minval=-0.1, maxval=0.1,
                            dtype=jnp.float32)
    wv = jax.random.uniform(k_wv, (D_V, D_F), minval=-0.1, maxval=0.1,
                            dtype=jnp.float32)
    # self.bias and self.score_proj exist in __init__ but are unused in forward.

    K, Q, V = jax.block_until_ready(kv_splitter(x, q, wk, wq, wv))

    # Pure-JAX reference check
    K_ref = x.T @ wk.T
    Q_ref = q.T @ wq.T
    V_ref = x.T @ wv.T
    assert K.shape == (N, D_K) and Q.shape == (M, D_Q) and V.shape == (N, D_V)
    assert jnp.allclose(K, K_ref, atol=1e-5)
    assert jnp.allclose(Q, Q_ref, atol=1e-5)
    assert jnp.allclose(V, V_ref, atol=1e-5)

    print("KERNEL_OK")
</pallas_src>

<mosaic_0001>
module attributes {stable_mosaic.version = 11 : i64} {
  func.func @_proj_kernel(%arg0: i32, %arg1: memref<32x48xf32, #tpu.memory_space<vmem>>, %arg2: memref<48x8xf32, #tpu.memory_space<vmem>>, %arg3: memref<32x8xf32, #tpu.memory_space<vmem>>) attributes {dimension_semantics = [#tpu.dimension_semantics<parallel>], iteration_bounds = array<i64: 1>, scalar_prefetch = 0 : i64, scratch_operands = 0 : i64, tpu.core_type = #tpu.core_type<tc>, window_params = [{pipeline_mode = #tpu.pipeline_mode<synchronous>, transform_indices = @transform_0, window_bounds = array<i64: 32, 48>}, {transform_indices = @transform_1, window_bounds = array<i64: 48, 8>}, {transform_indices = @transform_2, window_bounds = array<i64: 32, 8>}]} {
    %c0 = arith.constant 0 : index
    %c0_0 = arith.constant 0 : index
    %0 = vector.load %arg1[%c0, %c0_0] : memref<32x48xf32, #tpu.memory_space<vmem>>, vector<32x48xf32>
    %c0_1 = arith.constant 0 : index
    %c0_2 = arith.constant 0 : index
    %1 = vector.load %arg2[%c0_1, %c0_2] : memref<48x8xf32, #tpu.memory_space<vmem>>, vector<48x8xf32>
    %cst = arith.constant dense<0.000000e+00> : vector<32x8xf32>
    %2 = tpu.matmul %0, %1, %cst {dimension_numbers = #tpu.dot_dimension_numbers<[1], [0], [0], [1], [0, 0, 1, 1], [], []>} : vector<32x48xf32>, vector<48x8xf32>, vector<32x8xf32> -> vector<32x8xf32>
    %c0_3 = arith.constant 0 : index
    %c0_4 = arith.constant 0 : index
    %3 = vector.load %arg3[%c0_3, %c0_4] : memref<32x8xf32, #tpu.memory_space<vmem>>, vector<32x8xf32>
    tpu.vector_store %arg3[%c0_3, %c0_4], %2 {strides = array<i32>} : memref<32x8xf32, #tpu.memory_space<vmem>>, vector<32x8xf32>,
    return
  }
  func.func @transform_0(%arg0: i32) -> (i32, i32) {
    %c0_i32 = arith.constant 0 : i32
    %c0_i32_0 = arith.constant 0 : i32
    %c0_i32_1 = arith.constant 0 : i32
    return %c0_i32, %c0_i32_0 : i32, i32
  }
  func.func @transform_1(%arg0: i32) -> (i32, i32) {
    %c0_i32 = arith.constant 0 : i32
    %c0_i32_0 = arith.constant 0 : i32
    return %c0_i32, %arg0 : i32, i32
  }
  func.func @transform_2(%arg0: i32) -> (i32, i32) {
    %c0_i32 = arith.constant 0 : i32
    %c0_i32_0 = arith.constant 0 : i32
    return %c0_i32, %arg0 : i32, i32
  }
}

</mosaic_0001>

<bundles_post_ra>
// kernel: tpu_custom_call.1
= control target key start
LH: loop header
LB: loop body
LE: loop exit
PB: predicated region body
PF: predicated region fallthrough
CT: control target
= control target key end

     0   :  { %vm21_vm0 = vcmask 392192   ;;  %vm119_vm1 = vcmask 64512   ;;  %s239_s1 = inlined_call_operand.vmem [shape: f32[48,8], index: 1, kind: input, shape index: {}]   ;;  %s240_s0 = inlined_call_operand.vmem [shape: f32[32,48], index: 0, kind: input, shape index: {}]   ;;  %s241_s2 = inlined_call_operand.vmem [shape: f32[32,8], index: 2, kind: output, shape index: {}]  }
   0x1   :  { %v15_v0 = vld [vmem:[%s239_s1] sm:$0xff]  ;;  %v16_v1 = vld [vmem:[%s239_s1 + $0x8] sm:$0xff]  ;;  %v17_v2 = vld [vmem:[%s239_s1 + $0x10] sm:$0xff] }
   0x2   :  { %v160_v3 = vpack.c.bf16 %v16_v1, %v15_v0  ;;  %v18_v4 = vld [vmem:[%s239_s1 + $0x18] sm:$0xff]  ;;  %v19_v6 = vld [vmem:[%s239_s1 + $0x20] sm:$0xff]  ;;  %v20_v7 = vld [vmem:[%s239_s1 + $0x28] sm:$0xff] }
   0x3   :  { %v164_v5 = vpack.c.bf16 %v18_v4, %v17_v2  ;;  %v11_v8 = vld [vmem:[%s240_s0] sm:$0xff]  ;;  %v13_v9 = vld [vmem:[%s240_s0 + $0x10] sm:$0xff]  ;;  %v168_v10 = vpack.c.bf16 %v20_v7, %v19_v6  ;;  %v12_v11 = vld [vmem:[%s240_s0 + $0x8] sm:$0xff] }
   0x4   :  { %161 = vmatprep.subr.bf16.mxu0 %v160_v3  ;;  %172 = vmatprep.subr.bf16.mxu1 %v160_v3  ;;  %v14_v12 = vld [vmem:[%s240_s0 + $0x18] sm:$0xff] }
   0x5   :  { %163 = vmatpush3.bf16.msra.mxu0 %v160_v3  ;;  %175 = vmatpush3.bf16.msra.mxu1 %v160_v3 }
   0x6   :  { %165 = vmatprep.subr.bf16.mxu0 %v164_v5  ;;  %173 = vmatprep.subr.bf16.mxu1 %v164_v5 }
   0x7   :  { %154 = vmatprep.mubr.msk.f32.mxu0 %vm21_vm0, %v11_v8  ;;  %157 = vmatprep.mubr.msk.f32.mxu1 %vm21_vm0, %v13_v9 }
   0x9   :  { %167 = vmatpush3.bf16.msra.mxu0 %v164_v5  ;;  %176 = vmatpush3.bf16.msra.mxu1 %v164_v5 }
   0xa   :  { %169 = vmatprep.subr.bf16.mxu0 %v168_v10  ;;  %174 = vmatprep.subr.bf16.mxu1 %v168_v10 }
   0xd   :  { %171 = vmatpush3.bf16.msra.mxu0 %v168_v10  ;;  %177 = vmatpush3.bf16.msra.mxu1 %v168_v10 }
  0x10   :  { %155 = vmatmul.mubr.msk.f32.vlgmr.msra.gmra.mrb[0].mxu0 %vm21_vm0, %v12_v11  ;;  %158 = vmatmul.mubr.msk.f32.vlgmr.msra.gmra.mrb[0].mxu1 %vm21_vm0, %v14_v12 }
  0xe3   :  { %v156_v13 = vpop.f32.mrb[0].mxu0  ;;  %v159_v14 = vpop.f32.mrb[0].mxu1 }
  0xe4   :  { %121 = vst.msk [vmem:[%s241_s2 + $0x8] sm:$0xff] %vm119_vm1, %v156_v13  ;;  %123 = vst.msk [vmem:[%s241_s2 + $0x18] sm:$0xff] %vm119_vm1, %v159_v14  ;;  %v100_v15 = vpop.f32.mrb[1].mxu0  ;;  %v110_v16 = vpop.f32.mrb[1].mxu1 }
  0xe5   :  { %120 = vst.msk [vmem:[%s241_s2] sm:$0xff] %vm119_vm1, %v100_v15  ;;  %122 = vst.msk [vmem:[%s241_s2 + $0x10] sm:$0xff] %vm119_vm1, %v110_v16 }

</bundles_post_ra>
